<compile_context>
chip_gen: v5e
topology: v5e:2x2
jax: 0.10.0
libtpu: 0.0.40
codegen_flags: <defaults>
</compile_context>

<pallas_src>
import functools

import jax
import jax.numpy as jnp
from jax.experimental import pallas as pl
from jax.experimental.pallas import tpu as pltpu


def _patch_embed_kernel(w_ref, p_ref, b_ref, o_ref):
    # w_ref: (E, K) bf16 resident weight
    # p_ref: (K, TM) bf16 patch tile (streamed over M)
    # b_ref: (E, 1)  f32 resident bias
    # o_ref: (E, TM) output tile, lane-dense (TM % 128 == 0)
    acc = jnp.dot(w_ref[...], p_ref[...], preferred_element_type=jnp.float32)
    o_ref[...] = (acc + b_ref[...]).astype(o_ref.dtype)


def patch_embed_forward(x, weight, bias, patch_size, *,
                        compute_dtype=jnp.bfloat16, tile_m=512):
    """x: (B, C, H, W) NCHW. weight: (E, C, ph, pw). bias: (E,).
    Returns (B, E, H//ph, W//pw) — identical to nn.Conv2d(stride=kernel=patch)."""
    B, C, H, W = x.shape
    ph, pw = patch_size
    E = weight.shape[0]
    Hp, Wp = H // ph, W // pw

    # Match VALID / stride=kernel conv: extra rows/cols are silently dropped.
    if H != Hp * ph or W != Wp * pw:
        x = x[:, :, :Hp * ph, :Wp * pw]

    M = B * Hp * Wp
    K = C * ph * pw

    # ---- glue: patches in (K, M) layout; K order is (c, kh, kw), matching the
    # PyTorch conv-weight flattening, so the weight needs only a reshape. ----
    p = x.reshape(B, C, Hp, ph, Wp, pw)
    p = jnp.transpose(p, (1, 3, 5, 0, 2, 4)).reshape(K, M)
    w = weight.reshape(E, K)

    # Lane tile over M: multiple of 128, capped at tile_m, padded with zeros.
    tm = max(128, min(tile_m, pl.cdiv(M, 128) * 128))
    m_pad = pl.cdiv(M, tm) * tm
    if m_pad != M:
        p = jnp.pad(p, ((0, 0), (0, m_pad - M)))

    p = p.astype(compute_dtype)
    w = w.astype(compute_dtype)
    b = bias.reshape(E, 1).astype(jnp.float32)

    out_t = pl.pallas_call(
        _patch_embed_kernel,
        out_shape=jax.ShapeDtypeStruct((E, m_pad), x.dtype),
        grid_spec=pltpu.PrefetchScalarGridSpec(
            num_scalar_prefetch=0,
            grid=(m_pad // tm,),
            in_specs=[
                pl.BlockSpec((E, K), lambda i: (0, 0)),    # weight: resident
                pl.BlockSpec((K, tm), lambda i: (0, i)),   # patch tile: streamed
                pl.BlockSpec((E, 1), lambda i: (0, 0)),    # bias: resident
            ],
            out_specs=pl.BlockSpec((E, tm), lambda i: (0, i)),
        ),
        compiler_params=pltpu.CompilerParams(
            dimension_semantics=("parallel",),
            vmem_limit_bytes=32 * 1024 * 1024,
        ),
    )(w, p, b)

    # ---- glue: (E, M) -> NCHW conv-output layout (B, E, Hp, Wp) ----
    out = out_t[:, :M].reshape(E, B, Hp, Wp)
    return jnp.transpose(out, (1, 0, 2, 3))


if __name__ == "__main__":
    # Small shapes consistent with the module: img 16x16, patch 8x8, 3 channels,
    # embed_dim 32. num_patches per image = (16//8)*(16//8) = 4.
    B, C, H, W = 2, 3, 16, 16
    patch_size = (8, 8)
    embed_dim = 32

    key = jax.random.PRNGKey(0)
    kx, kw, kb = jax.random.split(key, 3)

    x = jax.random.normal(kx, (B, C, H, W), dtype=jnp.float32)
    weight = jax.random.normal(
        kw, (embed_dim, C, patch_size[0], patch_size[1]), dtype=jnp.float32) * 0.02
    bias = jax.random.normal(kb, (embed_dim,), dtype=jnp.float32) * 0.02

    # TODO(synk): self.up1 (nn.Upsample) is defined in __init__ but never used
    # in forward, so it is intentionally not implemented.

    fwd = jax.jit(functools.partial(patch_embed_forward, patch_size=patch_size))
    out = jax.block_until_ready(fwd(x, weight, bias))

    # Reference: strided conv on the same bf16-cast operands with f32 accumulation
    # (apples-to-apples with the kernel's bf16 MXU path).
    ref = jax.lax.conv_general_dilated(
        x.astype(jnp.bfloat16), weight.astype(jnp.bfloat16),
        window_strides=patch_size, padding="VALID",
        dimension_numbers=("NCHW", "OIHW", "NCHW"),
        preferred_element_type=jnp.float32,
    ) + bias.reshape(1, embed_dim, 1, 1)

    assert out.shape == (B, embed_dim, H // patch_size[0], W // patch_size[1])
    assert jnp.allclose(out.astype(jnp.float32), ref, atol=1e-2, rtol=1e-2)

    print("KERNEL_OK")
</pallas_src>

<mosaic_0001>
module attributes {stable_mosaic.version = 11 : i64} {
  func.func @_patch_embed_kernel(%arg0: i32, %arg1: memref<32x192xbf16, #tpu.memory_space<vmem>>, %arg2: memref<192x128xbf16, #tpu.memory_space<vmem>>, %arg3: memref<32x1xf32, #tpu.memory_space<vmem>>, %arg4: memref<32x128xf32, #tpu.memory_space<vmem>>) attributes {dimension_semantics = [#tpu.dimension_semantics<parallel>], iteration_bounds = array<i64: 1>, scalar_prefetch = 0 : i64, scratch_operands = 0 : i64, tpu.core_type = #tpu.core_type<tc>, window_params = [{pipeline_mode = #tpu.pipeline_mode<synchronous>, transform_indices = @transform_0, window_bounds = array<i64: 32, 192>}, {transform_indices = @transform_1, window_bounds = array<i64: 192, 128>}, {pipeline_mode = #tpu.pipeline_mode<synchronous>, transform_indices = @transform_2, window_bounds = array<i64: 32, 1>}, {transform_indices = @transform_3, window_bounds = array<i64: 32, 128>}]} {
    %c0 = arith.constant 0 : index
    %c0_0 = arith.constant 0 : index
    %0 = vector.load %arg1[%c0, %c0_0] : memref<32x192xbf16, #tpu.memory_space<vmem>>, vector<32x192xbf16>
    %c0_1 = arith.constant 0 : index
    %c0_2 = arith.constant 0 : index
    %1 = vector.load %arg2[%c0_1, %c0_2] : memref<192x128xbf16, #tpu.memory_space<vmem>>, vector<192x128xbf16>
    %cst = arith.constant dense<0.000000e+00> : vector<32x128xf32>
    %2 = tpu.matmul %0, %1, %cst {dimension_numbers = #tpu.dot_dimension_numbers<[1], [0], [0], [1], [0, 0, 1, 1], [], []>} : vector<32x192xbf16>, vector<192x128xbf16>, vector<32x128xf32> -> vector<32x128xf32>
    %c0_3 = arith.constant 0 : index
    %c0_4 = arith.constant 0 : index
    %3 = vector.load %arg3[%c0_3, %c0_4] : memref<32x1xf32, #tpu.memory_space<vmem>>, vector<32x1xf32>
    %4 = vector.broadcast %3 : vector<32x1xf32> to vector<32x128xf32>
    %5 = arith.addf %2, %4 : vector<32x128xf32>
    %c0_5 = arith.constant 0 : index
    %c0_6 = arith.constant 0 : index
    %6 = vector.load %arg4[%c0_5, %c0_6] : memref<32x128xf32, #tpu.memory_space<vmem>>, vector<32x128xf32>
    tpu.vector_store %arg4[%c0_5, %c0_6], %5 {strides = array<i32>} : memref<32x128xf32, #tpu.memory_space<vmem>>, vector<32x128xf32>,
    return
  }
  func.func @transform_0(%arg0: i32) -> (i32, i32) {
    %c0_i32 = arith.constant 0 : i32
    %c0_i32_0 = arith.constant 0 : i32
    %c0_i32_1 = arith.constant 0 : i32
    return %c0_i32, %c0_i32_0 : i32, i32
  }
  func.func @transform_1(%arg0: i32) -> (i32, i32) {
    %c0_i32 = arith.constant 0 : i32
    %c0_i32_0 = arith.constant 0 : i32
    return %c0_i32, %arg0 : i32, i32
  }
  func.func @transform_2(%arg0: i32) -> (i32, i32) {
    %c0_i32 = arith.constant 0 : i32
    %c0_i32_0 = arith.constant 0 : i32
    %c0_i32_1 = arith.constant 0 : i32
    return %c0_i32, %c0_i32_0 : i32, i32
  }
  func.func @transform_3(%arg0: i32) -> (i32, i32) {
    %c0_i32 = arith.constant 0 : i32
    %c0_i32_0 = arith.constant 0 : i32
    return %c0_i32, %arg0 : i32, i32
  }
}

</mosaic_0001>

<bundles_post_ra>
// kernel: patch_embed_forward.1
= control target key start
LH: loop header
LB: loop body
LE: loop exit
PB: predicated region body
PF: predicated region fallthrough
CT: control target
= control target key end

     0   :  { %v303_v4 = vmov 0   ;;  %vm157_vm0 = vcmask 523264   ;;  %s410_s1 = inlined_call_operand.vmem [shape: bf16[192,128], index: 1, kind: input, shape index: {}]   ;;  %s411_s2 = inlined_call_operand.vmem [shape: f32[32,1], index: 2, kind: input, shape index: {}]   ;;  %s412_s0 = inlined_call_operand.vmem [shape: bf16[32,192], index: 0, kind: input, shape index: {}]   ;;  %s413_s3 = inlined_call_operand.vmem [shape: f32[32,128], index: 3, kind: output, shape index: {}]  }
   0x1   :  { %v287_v0 = vld [vmem:[%s410_s1 + $0x38] sm:$0xff]  ;;  %v286_v2 = vld [vmem:[%s410_s1 + $0x30] sm:$0xff]  ;;  %302 = vset.pattern.permute.xlu1 %v303_v4  ;;  %301 = vset.pattern.permute.xlu0 %v303_v4  ;;  %v285_v5 = vld [vmem:[%s410_s1 + $0x28] sm:$0xff] }
   0x2   :  { %v291_v1 = vld [vmem:[%s410_s1 + $0x58] sm:$0xff]  ;;  %164 = vmatpush.bf16.msra.mxu0 %v287_v0  ;;  %292 = vmatpush.bf16.msra.mxu2 %v287_v0  ;;  %v290_v3 = vld [vmem:[%s410_s1 + $0x50] sm:$0xff]  ;;  %v289_v7 = vld [vmem:[%s410_s1 + $0x48] sm:$0xff] }
   0x3   :  { %187 = vmatpush.bf16.msra.mxu1 %v291_v1  ;;  %v45_v6 = vld [vmem:[%s411_s2 + $0x10] sm:$0xff]  ;;  %v43_v8 = vld [vmem:[%s411_s2] sm:$0xff]  ;;  %v214_v12 = vld [vmem:[%s412_s0 + $0x8] sm:$0xf0] }
   0x4   :  { %59 = vperm.xlu1 %302, %v45_v6   ;;  %49 = vperm.xlu0 %301, %v43_v8   ;;  %v284_v9 = vld [vmem:[%s410_s1 + $0x20] sm:$0xff]  ;;  %v46_v13 = vld [vmem:[%s411_s2 + $0x18] sm:$0xff]  ;;  %v44_v14 = vld [vmem:[%s411_s2 + $0x8] sm:$0xff] }
   0x5   :  { %v288_v10 = vld [vmem:[%s410_s1 + $0x40] sm:$0xff]  ;;  %v283_v16 = vld [vmem:[%s410_s1 + $0x18] sm:$0xff]  ;;  %v282_v17 = vld [vmem:[%s410_s1 + $0x10] sm:$0xff] }
   0x6   :  { %165 = vmatpush.bf16.msra.mxu0 %v286_v2  ;;  %293 = vmatpush.bf16.msra.mxu2 %v286_v2  ;;  %v276_v11 = vld [vmem:[%s412_s0 + $0x4] sm:$0xf]  ;;  %v281_v18 = vld [vmem:[%s410_s1 + $0x8] sm:$0xff]  ;;  %v212_v20 = vld [vmem:[%s412_s0] sm:$0xf] }
   0x7   :  { %188 = vmatpush.bf16.msra.mxu1 %v290_v3  ;;  %v217_v15 = vor.u32 %v276_v11, %v214_v12  ;;  %v280_v19 = vld [vmem:[%s410_s1] sm:$0xff]  ;;  %v277_v21 = vld [vmem:[%s412_s0 + $0x4] sm:$0xf0]  ;;  %v220_v22 = vld [vmem:[%s412_s0 + $0x10] sm:$0xf] }
   0x8   :  { %v279_v23 = vld [vmem:[%s412_s0 + $0x14] sm:$0xf0]  ;;  %v278_v24 = vld [vmem:[%s412_s0 + $0x14] sm:$0xf]  ;;  %v222_v25 = vld [vmem:[%s412_s0 + $0x18] sm:$0xf0]  ;;  %v213_v26 = vor.u32 %v277_v21, %v212_v20 }
   0x9   :  { %v221_v27 = vor.u32 %v279_v23, %v220_v22  ;;  %v225_v28 = vor.u32 %v278_v24, %v222_v25 }
   0xa   :  { %166 = vmatpush.bf16.msra.mxu0 %v285_v5  ;;  %294 = vmatpush.bf16.msra.mxu2 %v285_v5 }
   0xb   :  { %189 = vmatpush.bf16.msra.mxu1 %v289_v7 }
   0xc   :  { %64 = vperm.xlu1 %302, %v46_v13   ;;  %54 = vperm.xlu0 %301, %v44_v14  }
   0xe   :  { %167 = vmatpush.bf16.msra.mxu0 %v284_v9  ;;  %295 = vmatpush.bf16.msra.mxu2 %v284_v9 }
   0xf   :  { %190 = vmatpush.bf16.msra.mxu1 %v288_v10 }
  0x12   :  { %274 = vmatmul.msk.bf16.vlgmr.msra.gmra.mxu1 %vm157_vm0, %v217_v15  ;;  %168 = vmatpush.bf16.msra.mxu0 %v283_v16 }
  0x13   :  { %296 = vmatpush.bf16.msra.mxu2 %v283_v16 }
  0x16   :  { %169 = vmatpush.bf16.msra.mxu0 %v282_v17 }
  0x17   :  { %297 = vmatpush.bf16.msra.mxu2 %v282_v17 }
  0x1a   :  { %170 = vmatpush.bf16.msra.mxu0 %v281_v18 }
  0x1b   :  { %298 = vmatpush.bf16.msra.mxu2 %v281_v18 }
  0x1e   :  { %171 = vmatpush.bf16.msra.mxu0 %v280_v19 }
  0x1f   :  { %299 = vmatpush.bf16.msra.mxu2 %v280_v19 }
  0x21   :  { %172 = vmatmul.bf16.vlgmr.msra.gmra.mxu0 %v213_v26 }
  0x22   :  { %177 = vmatmul.bf16.vlgmr.msra.gmra.mxu2 %v221_v27  ;;  %275 = vmatmul.msk.bf16.gmra.mxu1 %vm157_vm0, %v225_v28 }
  0x76   :  { %v50_v31 = vpop.permute.xlu0 %49  ;;  %v60_v35 = vpop.permute.xlu1 %59 }
  0x7e   :  { %v55_v38 = vpop.permute.xlu0 %54  ;;  %v65_v44 = vpop.permute.xlu1 %64 }
  0x8f   :  { %v192_v29 = vpop.f32.mrf.mxu1 }
  0x97   :  { %v194_v30 = vpop.f32.mrf.mxu1 }
  0x9e   :  { %v173_v32 = vpop.f32.mrf.mxu0 }
  0x9f   :  { %v174_v33 = vadd.f32 %v173_v32, %v50_v31  ;;  %v197_v36 = vpop.f32.mrf.mxu1 }
  0xa1   :  { %v193_v34 = vadd.f32 %v192_v29, %v174_v33 }
  0xa3   :  { %202 = vst [vmem:[%s413_s3] sm:$0xff] %v193_v34 }
  0xa5   :  { %v178_v37 = vpop.f32.mrf.mxu2 }
  0xa6   :  { %v179_v39 = vadd.f32 %v178_v37, %v60_v35  ;;  %v175_v40 = vpop.f32.mrf.mxu0 }
  0xa7   :  { %v176_v41 = vadd.f32 %v175_v40, %v55_v38  ;;  %v199_v47 = vpop.f32.mrf.mxu1 }
  0xa8   :  { %v198_v42 = vadd.f32 %v197_v36, %v179_v39 }
  0xa9   :  { %v195_v43 = vadd.f32 %v194_v30, %v176_v41 }
  0xaa   :  { %204 = vst [vmem:[%s413_s3 + $0x10] sm:$0xff] %v198_v42 }
  0xab   :  { %203 = vst [vmem:[%s413_s3 + $0x8] sm:$0xff] %v195_v43 }
  0xad   :  { %v180_v45 = vpop.f32.mrf.mxu2 }
  0xae   :  { %v181_v46 = vadd.f32 %v180_v45, %v65_v44 }
  0xb0   :  { %v200_v48 = vadd.f32 %v199_v47, %v181_v46 }
  0xb2   :  { %205 = vst [vmem:[%s413_s3 + $0x18] sm:$0xff] %v200_v48 }

</bundles_post_ra>
